<compile_context>
chip_gen: v5e
topology: v5e:2x2
jax: 0.10.0
libtpu: 0.0.40
codegen_flags: <defaults>
</compile_context>

<pallas_src>
import jax
import jax.numpy as jnp
from jax.experimental import pallas as pl
from jax.experimental.pallas import tpu as pltpu


# ----------------------------------------------------------------------------
# Pallas kernel: out = x + pos   (pos broadcast over the batch grid axis)
# ----------------------------------------------------------------------------
def _pos_add_kernel(x_ref, pos_ref, o_ref):
    o_ref[...] = x_ref[...] + pos_ref[...]


def _pick_seq_tile(S, D, itemsize):
    """Largest seq tile that keeps (8,128) tiling legal, divides S evenly and
    fits a conservative double-buffered VMEM budget (x + pos + out tiles)."""
    if D % 128 != 0 or S % 8 != 0:
        # Full-extent blocks on the last two dims are always legal.
        return S
    budget_bytes = 8 * 1024 * 1024            # well under scoped VMEM default
    per_row = 3 * 2 * D * itemsize            # 3 arrays, double buffered
    max_rows = max(8, budget_bytes // per_row)
    if S <= max_rows:
        return S
    for cand in (2048, 1024, 512, 256, 128, 64, 32, 16, 8):
        if cand <= max_rows and S % cand == 0:
            return cand
    return S


def add_positional_embedding(x, pos):
    """x: (B, S, D); pos: (1, S, D) or (S, D).  Returns x + pos."""
    B, S, D = x.shape
    pos3 = jnp.asarray(pos, dtype=x.dtype).reshape(1, S, D)
    ts = _pick_seq_tile(S, D, jnp.dtype(x.dtype).itemsize)
    grid = (B, S // ts)

    return pl.pallas_call(
        _pos_add_kernel,
        out_shape=jax.ShapeDtypeStruct((B, S, D), x.dtype),
        grid_spec=pltpu.PrefetchScalarGridSpec(
            num_scalar_prefetch=0,
            grid=grid,
            in_specs=[
                pl.BlockSpec((1, ts, D), lambda b, j: (b, j, 0)),   # x tile
                pl.BlockSpec((1, ts, D), lambda b, j: (0, j, 0)),   # pos tile
            ],
            out_specs=pl.BlockSpec((1, ts, D), lambda b, j: (b, j, 0)),
        ),
        compiler_params=pltpu.CompilerParams(
            dimension_semantics=("parallel", "parallel")),
    )(x, pos3)


# ----------------------------------------------------------------------------
# Module-equivalent wrapper
# ----------------------------------------------------------------------------
def positional_embedding_1d_forward(x, params):
    return add_positional_embedding(x, params["pos_embedding"])


def init_params(key, seq_len, dim):
    # nn.Parameter(torch.zeros(1, seq_len, dim)) — init to zeros.  We add a
    # small random perturbation below in __main__ to make the test nontrivial
    # (a trained pos_embedding is non-zero); forward semantics are identical.
    return {"pos_embedding": jnp.zeros((1, seq_len, dim), jnp.float32)}


if __name__ == "__main__":
    batch, seq_len, dim = 4, 256, 256          # small, lane/sublane friendly

    key = jax.random.PRNGKey(0)
    k_x, k_p = jax.random.split(key, 2)
    x = jax.random.normal(k_x, (batch, seq_len, dim), jnp.float32)

    params = init_params(k_p, seq_len, dim)
    # Simulate a trained (non-zero) positional table for a meaningful check.
    params["pos_embedding"] = 0.02 * jax.random.normal(
        k_p, (1, seq_len, dim), jnp.float32)

    out = jax.jit(positional_embedding_1d_forward)(x, params)
    jax.block_until_ready(out)

    ref = x + params["pos_embedding"]
    assert out.shape == (batch, seq_len, dim)
    assert bool(jnp.all(jnp.isfinite(out)))
    assert bool(jnp.allclose(out, ref, atol=1e-6, rtol=1e-6))
    print("KERNEL_OK")
</pallas_src>

<mosaic_0001>
module attributes {stable_mosaic.version = 11 : i64} {
  func.func @_pos_add_kernel(%arg0: i32, %arg1: i32, %arg2: memref<1x256x256xf32, #tpu.memory_space<vmem>>, %arg3: memref<1x256x256xf32, #tpu.memory_space<vmem>>, %arg4: memref<1x256x256xf32, #tpu.memory_space<vmem>>) attributes {dimension_semantics = [#tpu.dimension_semantics<parallel>, #tpu.dimension_semantics<parallel>], iteration_bounds = array<i64: 4, 1>, scalar_prefetch = 0 : i64, scratch_operands = 0 : i64, tpu.core_type = #tpu.core_type<tc>, window_params = [{transform_indices = @transform_0, window_bounds = array<i64: 1, 256, 256>}, {transform_indices = @transform_1, window_bounds = array<i64: 1, 256, 256>}, {transform_indices = @transform_2, window_bounds = array<i64: 1, 256, 256>}]} {
    %c0 = arith.constant 0 : index
    %c0_0 = arith.constant 0 : index
    %c0_1 = arith.constant 0 : index
    %0 = vector.load %arg2[%c0, %c0_0, %c0_1] : memref<1x256x256xf32, #tpu.memory_space<vmem>>, vector<1x256x256xf32>
    %c0_2 = arith.constant 0 : index
    %c0_3 = arith.constant 0 : index
    %c0_4 = arith.constant 0 : index
    %1 = vector.load %arg3[%c0_2, %c0_3, %c0_4] : memref<1x256x256xf32, #tpu.memory_space<vmem>>, vector<1x256x256xf32>
    %2 = arith.addf %0, %1 : vector<1x256x256xf32>
    %c0_5 = arith.constant 0 : index
    %c0_6 = arith.constant 0 : index
    %c0_7 = arith.constant 0 : index
    %3 = vector.load %arg4[%c0_5, %c0_6, %c0_7] : memref<1x256x256xf32, #tpu.memory_space<vmem>>, vector<1x256x256xf32>
    tpu.vector_store %arg4[%c0_5, %c0_6, %c0_7], %2 {strides = array<i32>} : memref<1x256x256xf32, #tpu.memory_space<vmem>>, vector<1x256x256xf32>,
    return
  }
  func.func @transform_0(%arg0: i32, %arg1: i32) -> (i32, i32, i32) {
    %c0_i32 = arith.constant 0 : i32
    %c0_i32_0 = arith.constant 0 : i32
    return %arg0, %arg1, %c0_i32 : i32, i32, i32
  }
  func.func @transform_1(%arg0: i32, %arg1: i32) -> (i32, i32, i32) {
    %c0_i32 = arith.constant 0 : i32
    %c0_i32_0 = arith.constant 0 : i32
    %c0_i32_1 = arith.constant 0 : i32
    return %c0_i32, %arg1, %c0_i32_0 : i32, i32, i32
  }
  func.func @transform_2(%arg0: i32, %arg1: i32) -> (i32, i32, i32) {
    %c0_i32 = arith.constant 0 : i32
    %c0_i32_0 = arith.constant 0 : i32
    return %arg0, %arg1, %c0_i32 : i32, i32, i32
  }
}

</mosaic_0001>

<bundles_post_ra>
// kernel: positional_embedding_1d_forward.1
= control target key start
LH: loop header
LB: loop body
LE: loop exit
PB: predicated region body
PF: predicated region fallthrough
CT: control target
= control target key end

     0   :  { %7 = vsyncpa [#allocation3], 0  ;;  %s1136_s0 = inlined_call_operand.hbm [shape: f32[4,256,256], index: 0, kind: input, shape index: {}]   ;;  %s1137_s1 = inlined_call_operand.hbm [shape: f32[1,256,256], index: 1, kind: input, shape index: {}]   ;;  %s1138_s2 = inlined_call_operand.hbm [shape: f32[4,256,256], index: 2, kind: output, shape index: {}]  }
   0x1   :  { %9 = vsyncpa [#allocation3 + $0x1], 0 }
   0x2   :  { %10 = vsyncpa [#allocation6], 0 }
   0x3   :  { %11 = vsyncpa [#allocation4], 0 }
   0x4   :  { %13 = vsyncpa [#allocation4 + $0x1], 0  ;;  %s850_s9 = smov 0   ;;  %s852_s10 = smov 0  }
   0x5   :  { %s854_s11 = smov 0   ;;  %s856_s12 = smov 0  }
   0x6   :  { %s858_s13 = smov 0   ;;  %s860_s14 = smov 0  }
   0x7 LB: > { %s586_s15 = sadd.s32 4294967295, %s828_s14   ;;  %s587_s16 = sadd.s32 4294967294, %s828_s14   ;;  %s828_s14 = sphi %s860_s14, %s19_s14   ;;  %s824_s13 = sphi %s858_s13, %s1150_s13   ;;  %s820_s12 = sphi %s856_s12, %s1149_s12   ;;  %s816_s11 = sphi %s854_s11, %s1148_s11   ;;  %s812_s10 = sphi %s852_s10, %s1147_s10   ;;  %s808_s9 = sphi %s850_s9, %s1146_s9  }
   0x8   : > { %p53_p0 = scmp.ne.s32.totalorder %s812_s10, %s808_s9  ;;  %p884_p1 = scmp.eq.s32.totalorder %s586_s15, 0 }
   0x9   : > { %p888_p2 = scmp.eq.s32.totalorder %s586_s15, 3  ;;  %p111_p3 = scmp.eq.s32.totalorder %s587_s16, 3 }
   0xa   : > { %p894_p4 = por %p884_p1, %p53_p0  ;;  %p588_p5 = scmp.ge.s32.totalorder %s828_s14, 1 }
   0xb   : > { %p899_p6 = por %p111_p3, %p53_p0  ;;  %p118_p7 = scmp.lt.s32.totalorder %s828_s14, 5 }
   0xc   : > { %s133_s23 = sshll.u32 %s1137_s1, 4  ;;  %s830_s25 = smov [#allocation5]   ;;  %s134_s23 = int_to_ptr.hbm [resolvable:$true] %s133_s23 }
   0xd   : > { %p907_p8 = pnand %p588_p5, %p118_p7  ;;  %s135_s26 = sshll.u32 %s830_s25, 4  ;;  %s136_s26 = int_to_ptr.vmem [resolvable:$true] %s135_s26 }
   0xe   : > { %s831_s27 = smov 256   ;;  %s832_s28 = smov 16  }
   0xf   : > { %p613_p9 = pneg %p907_p8  ;;  %s31_s29 = sadd.s32 1, %s824_s13 }
  0x10   : > { %p33_p11 = scmp.ge.s32.totalorder %s31_s29, 4  ;;  %s40_s30 = sadd.s32 1, %s816_s11 }
  0x11   : > { %p614_p10 = pnand %p613_p9, %p884_p1  ;;  %p47_p12 = scmp.ne.s32.totalorder %s816_s11, %s812_s10 }
  0x12   : > { %p48_p13 = scmp.eq.s32.totalorder %s828_s14, 0  ;;  %s1152_s29 = smov (%p33_p11, %s31_s29), 0 }
  0x13   : > { %616 = dma.hbm_to_vmem [thread:$0]  (!%p614_p10), %s134_s23, 8192, %s136_s26, [#allocation6], %s831_s27, %s831_s27, %s832_s28  }
  0x14   : > { %p925_p0 = por %p48_p13, %p47_p12  ;;  %p931_p3 = por %p888_p2, %p47_p12 }
  0x15   : > { %s35_s5 = ssub.s32 %s824_s13, %s1152_s29  ;;  %p626_p5 = scmp.lt.s32.totalorder %s828_s14, 4 }
  0x16   : > { %p38_p7 = scmp.eq.s32.totalorder %s35_s5, 0  ;;  %s149_s6 = sand.u32 1, %s816_s11  }
  0x17   : > { %s591_s7 = sshll.u32 %s149_s6, 9  ;;  %s603_s15 = sshll.u32 %s824_s13, 9 }
  0x18   : > { %s940_s8 = scalar_select %p38_p7, %s816_s11, %s40_s30  }
  0x19   : > { %s161_s22 = scalar_lea.hbm %s1136_s0, %s603_s15  ;;  %s153_s23 = scalar_lea.vmem [#allocation2], %s591_s7 }
  0x1a   : > { %s164_s25 = sshll.u32 %s153_s23, 4  ;;  %s162_s18 = sshll.u32 %s161_s22, 4  ;;  %s165_s25 = int_to_ptr.vmem [resolvable:$true] %s164_s25  ;;  %s163_s18 = int_to_ptr.hbm [resolvable:$true] %s162_s18 }
  0x1b   : > { %p618_p2 = pnand %p626_p5, %p925_p0  ;;  %s150_s26 = scalar_lea.sflag [#allocation3], %s149_s6 }
  0x1c   : > { %176 = sbr.rel (%p907_p8) target bundleno = 107 (0x6b), region = 28  ;;  %s954_s30 = sand.u32 (!%p907_p8), 1, %s812_s10  }
  0x1d   : > { %620 = dma.hbm_to_vmem [thread:$0]  (!%p618_p2), %s163_s18, 8192, %s165_s25, %s150_s26, %s831_s27, %s831_s27, %s832_s28  }
  0x1e   : > { %s595_s5 = sshll.u32 (!%p907_p8), %s954_s30, 9  ;;  %s179_s7 = scalar_lea.sflag (!%p907_p8), [#allocation3], %s954_s30 }
  0x1f   : > { %s958_s15 = scalar_lea.vmem (!%p907_p8), [#allocation2], %s595_s5 }
  0x21   : > { %795 = dma.done.wait (%p894_p4), %s179_s7, 8192  }
  0x22   : > { %797 = vsyncadd (%p894_p4), %s179_s7, 4294959104 }
  0x23   : > { %799 = dma.done.wait (%p884_p1), [#allocation6], 8192  }
  0x24   : > { %801 = vsyncadd (%p884_p1), [#allocation6], 4294959104  ;;  %v212_v0 = vld [vmem:[%s958_s15] sm:$0xff]  ;;  %v213_v2 = vld [vmem:[%s958_s15 + $0x8] sm:$0xff]  ;;  %s973_s17 = scalar_lea.vmem [#allocation7], %s595_s5  ;;  %s604_s19 = sshll.u32 %s820_s12, 9 }
  0x25   : > { %v276_v1 = vld [vmem:[#allocation5] sm:$0xff]  ;;  %v277_v4 = vld [vmem:[#allocation5 + $0x8] sm:$0xff]  ;;  %v214_v5 = vld [vmem:[%s958_s15 + $0x10] sm:$0xff]  ;;  %s483_s27 = scalar_lea.hbm %s1138_s2, %s604_s19  ;;  %s484_s28 = sshll.u32 %s973_s17, 4  ;;  %s485_s28 = int_to_ptr.vmem [resolvable:$true] %s484_s28 }
  0x26   : > { %v340_v3 = vadd.f32 %v276_v1, %v212_v0  ;;  %v278_v6 = vld [vmem:[#allocation5 + $0x10] sm:$0xff]  ;;  %v341_v7 = vadd.f32 %v277_v4, %v213_v2  ;;  %v215_v9 = vld [vmem:[%s958_s15 + $0x18] sm:$0xff]  ;;  %v216_v11 = vld [vmem:[%s958_s15 + $0x20] sm:$0xff]  ;;  %s486_s3 = sshll.u32 %s483_s27, 4  ;;  %s469_s6 = scalar_lea.sflag [#allocation4], %s954_s30  ;;  %s487_s3 = int_to_ptr.hbm [resolvable:$true] %s486_s3 }
  0x27   : > { %v342_v8 = vadd.f32 %v278_v6, %v214_v5  ;;  %v279_v10 = vld [vmem:[#allocation5 + $0x18] sm:$0xff]  ;;  %v280_v13 = vld [vmem:[#allocation5 + $0x20] sm:$0xff]  ;;  %v217_v14 = vld [vmem:[%s958_s15 + $0x28] sm:$0xff]  ;;  %s756_s16 = sshra.s32 %s487_s3, 4  ;;  %s762_s25 = scalar_lea.hbm %s1138_s2, 2048  ;;  %s757_s16 = int_to_ptr.hbm [resolvable:$true] %s756_s16 }
  0x28   : > { %404 = vst [vmem:[%s973_s17] sm:$0xff] %v340_v3  ;;  %v343_v12 = vadd.f32 %v279_v10, %v215_v9  ;;  %v281_v15 = vld [vmem:[#allocation5 + $0x28] sm:$0xff]  ;;  %v344_v16 = vadd.f32 %v280_v13, %v216_v11  ;;  %v218_v18 = vld [vmem:[%s958_s15 + $0x30] sm:$0xff]  ;;  %v219_v20 = vld [vmem:[%s958_s15 + $0x38] sm:$0xff]  ;;  %s758_s21 = scalar_lea.hbm %s757_s16, 512  ;;  %p763_p9 = scmp.lt.s32.totalorder %s757_s16, %s1138_s2 }
  0x29   : > { %405 = vst [vmem:[%s973_s17 + $0x8] sm:$0xff] %v341_v7  ;;  %v345_v17 = vadd.f32 %v281_v15, %v217_v14  ;;  %v282_v19 = vld [vmem:[#allocation5 + $0x30] sm:$0xff]  ;;  %v283_v22 = vld [vmem:[#allocation5 + $0x38] sm:$0xff]  ;;  %v220_v23 = vld [vmem:[%s958_s15 + $0x40] sm:$0xff]  ;;  %p759_p1 = scmp.ne.s32.totalorder %s757_s16, %s758_s21  ;;  %p764_p10 = scmp.lt.s32.totalorder %s762_s25, %s758_s21 }
  0x2a   : > { %406 = vst [vmem:[%s973_s17 + $0x10] sm:$0xff] %v342_v8  ;;  %v346_v21 = vadd.f32 %v282_v19, %v218_v18  ;;  %v284_v24 = vld [vmem:[#allocation5 + $0x40] sm:$0xff]  ;;  %v347_v25 = vadd.f32 %v283_v22, %v219_v20  ;;  %v221_v26 = vld [vmem:[%s958_s15 + $0x48] sm:$0xff]  ;;  %v222_v28 = vld [vmem:[%s958_s15 + $0x50] sm:$0xff] }
  0x2b   : > { %407 = vst [vmem:[%s973_s17 + $0x18] sm:$0xff] %v343_v12  ;;  %v285_v27 = vld [vmem:[#allocation5 + $0x48] sm:$0xff]  ;;  %v348_v29 = vadd.f32 %v284_v24, %v220_v23  ;;  %v286_v30 = vld [vmem:[#allocation5 + $0x50] sm:$0xff]  ;;  %v223_v31 = vld [vmem:[%s958_s15 + $0x58] sm:$0xff]  ;;  %p760_p4 = pnand %p759_p1, %p931_p3  ;;  %p765_p11 = por %p764_p10, %p763_p9 }
  0x2c   : > { %408 = vst [vmem:[%s973_s17 + $0x20] sm:$0xff] %v344_v16  ;;  %v287_v32 = vld [vmem:[#allocation5 + $0x58] sm:$0xff]  ;;  %v349_v33 = vadd.f32 %v285_v27, %v221_v26  ;;  %v224_v34 = vld [vmem:[%s958_s15 + $0x60] sm:$0xff]  ;;  %v350_v36 = vadd.f32 %v286_v30, %v222_v28  ;;  %v225_v37 = vld [vmem:[%s958_s15 + $0x68] sm:$0xff] }
  0x2d   : > { %409 = vst [vmem:[%s973_s17 + $0x28] sm:$0xff] %v345_v17  ;;  %v288_v35 = vld [vmem:[#allocation5 + $0x60] sm:$0xff]  ;;  %v289_v38 = vld [vmem:[#allocation5 + $0x68] sm:$0xff]  ;;  %v351_v39 = vadd.f32 %v287_v32, %v223_v31  ;;  %v226_v40 = vld [vmem:[%s958_s15 + $0x70] sm:$0xff]  ;;  %p761_p8 = pneg %p760_p4 }
  0x2e   : > { %410 = vst [vmem:[%s973_s17 + $0x30] sm:$0xff] %v346_v21  ;;  %v290_v41 = vld [vmem:[#allocation5 + $0x70] sm:$0xff]  ;;  %v352_v42 = vadd.f32 %v288_v35, %v224_v34  ;;  %v227_v43 = vld [vmem:[%s958_s15 + $0x78] sm:$0xff]  ;;  %v353_v45 = vadd.f32 %v289_v38, %v225_v37  ;;  %v228_v46 = vld [vmem:[%s958_s15 + $0x80] sm:$0xff] }
  0x2f   : > { %411 = vst [vmem:[%s973_s17 + $0x38] sm:$0xff] %v347_v25  ;;  %v291_v44 = vld [vmem:[#allocation5 + $0x78] sm:$0xff]  ;;  %v292_v47 = vld [vmem:[#allocation5 + $0x80] sm:$0xff]  ;;  %v354_v48 = vadd.f32 %v290_v41, %v226_v40  ;;  %v229_v49 = vld [vmem:[%s958_s15 + $0x88] sm:$0xff]  ;;  %p766_p12 = pnand %p765_p11, %p761_p8 }
  0x30   : > { %412 = vst [vmem:[%s973_s17 + $0x40] sm:$0xff] %v348_v29  ;;  %v293_v50 = vld [vmem:[#allocation5 + $0x88] sm:$0xff]  ;;  %v355_v51 = vadd.f32 %v291_v44, %v227_v43  ;;  %v230_v52 = vld [vmem:[%s958_s15 + $0x90] sm:$0xff]  ;;  %v356_v54 = vadd.f32 %v292_v47, %v228_v46  ;;  %v231_v55 = vld [vmem:[%s958_s15 + $0x98] sm:$0xff] }
  0x31   : > { %413 = vst [vmem:[%s973_s17 + $0x48] sm:$0xff] %v349_v33  ;;  %v294_v53 = vld [vmem:[#allocation5 + $0x90] sm:$0xff]  ;;  %v295_v56 = vld [vmem:[#allocation5 + $0x98] sm:$0xff]  ;;  %v357_v57 = vadd.f32 %v293_v50, %v229_v49  ;;  %v232_v58 = vld [vmem:[%s958_s15 + $0xa0] sm:$0xff] }
  0x32   : > { %414 = vst [vmem:[%s973_s17 + $0x50] sm:$0xff] %v350_v36  ;;  %v296_v59 = vld [vmem:[#allocation5 + $0xa0] sm:$0xff]  ;;  %v358_v60 = vadd.f32 %v294_v53, %v230_v52  ;;  %v233_v61 = vld [vmem:[%s958_s15 + $0xa8] sm:$0xff]  ;;  %v359_v63 = vadd.f32 %v295_v56, %v231_v55  ;;  %v234_v0 = vld [vmem:[%s958_s15 + $0xb0] sm:$0xff] }
  0x33   : > { %415 = vst [vmem:[%s973_s17 + $0x58] sm:$0xff] %v351_v39  ;;  %v297_v62 = vld [vmem:[#allocation5 + $0xa8] sm:$0xff]  ;;  %v298_v1 = vld [vmem:[#allocation5 + $0xb0] sm:$0xff]  ;;  %v360_v2 = vadd.f32 %v296_v59, %v232_v58  ;;  %v235_v3 = vld [vmem:[%s958_s15 + $0xb8] sm:$0xff] }
  0x34   : > { %416 = vst [vmem:[%s973_s17 + $0x60] sm:$0xff] %v352_v42  ;;  %v299_v4 = vld [vmem:[#allocation5 + $0xb8] sm:$0xff]  ;;  %v361_v5 = vadd.f32 %v297_v62, %v233_v61  ;;  %v236_v6 = vld [vmem:[%s958_s15 + $0xc0] sm:$0xff]  ;;  %v362_v8 = vadd.f32 %v298_v1, %v234_v0  ;;  %v237_v9 = vld [vmem:[%s958_s15 + $0xc8] sm:$0xff] }
  0x35   : > { %417 = vst [vmem:[%s973_s17 + $0x68] sm:$0xff] %v353_v45  ;;  %v300_v7 = vld [vmem:[#allocation5 + $0xc0] sm:$0xff]  ;;  %v301_v10 = vld [vmem:[#allocation5 + $0xc8] sm:$0xff]  ;;  %v363_v11 = vadd.f32 %v299_v4, %v235_v3  ;;  %v238_v12 = vld [vmem:[%s958_s15 + $0xd0] sm:$0xff] }
  0x36   : > { %418 = vst [vmem:[%s973_s17 + $0x70] sm:$0xff] %v354_v48  ;;  %v302_v13 = vld [vmem:[#allocation5 + $0xd0] sm:$0xff]  ;;  %v364_v14 = vadd.f32 %v300_v7, %v236_v6  ;;  %v239_v15 = vld [vmem:[%s958_s15 + $0xd8] sm:$0xff]  ;;  %v365_v17 = vadd.f32 %v301_v10, %v237_v9  ;;  %v240_v18 = vld [vmem:[%s958_s15 + $0xe0] sm:$0xff] }
  0x37   : > { %419 = vst [vmem:[%s973_s17 + $0x78] sm:$0xff] %v355_v51  ;;  %v303_v16 = vld [vmem:[#allocation5 + $0xd8] sm:$0xff]  ;;  %v304_v19 = vld [vmem:[#allocation5 + $0xe0] sm:$0xff]  ;;  %v366_v20 = vadd.f32 %v302_v13, %v238_v12  ;;  %v241_v21 = vld [vmem:[%s958_s15 + $0xe8] sm:$0xff] }
  0x38   : > { %420 = vst [vmem:[%s973_s17 + $0x80] sm:$0xff] %v356_v54  ;;  %v305_v22 = vld [vmem:[#allocation5 + $0xe8] sm:$0xff]  ;;  %v367_v23 = vadd.f32 %v303_v16, %v239_v15  ;;  %v242_v24 = vld [vmem:[%s958_s15 + $0xf0] sm:$0xff]  ;;  %v368_v26 = vadd.f32 %v304_v19, %v240_v18  ;;  %v243_v27 = vld [vmem:[%s958_s15 + $0xf8] sm:$0xff] }
  0x39   : > { %421 = vst [vmem:[%s973_s17 + $0x88] sm:$0xff] %v357_v57  ;;  %v306_v25 = vld [vmem:[#allocation5 + $0xf0] sm:$0xff]  ;;  %v307_v28 = vld [vmem:[#allocation5 + $0xf8] sm:$0xff]  ;;  %v369_v29 = vadd.f32 %v305_v22, %v241_v21  ;;  %v244_v30 = vld [vmem:[%s958_s15 + $0x100] sm:$0xff] }
  0x3a   : > { %422 = vst [vmem:[%s973_s17 + $0x90] sm:$0xff] %v358_v60  ;;  %v308_v31 = vld [vmem:[#allocation5 + $0x100] sm:$0xff]  ;;  %v370_v32 = vadd.f32 %v306_v25, %v242_v24  ;;  %v245_v33 = vld [vmem:[%s958_s15 + $0x108] sm:$0xff]  ;;  %v371_v35 = vadd.f32 %v307_v28, %v243_v27  ;;  %v246_v36 = vld [vmem:[%s958_s15 + $0x110] sm:$0xff] }
  0x3b   : > { %423 = vst [vmem:[%s973_s17 + $0x98] sm:$0xff] %v359_v63  ;;  %v309_v34 = vld [vmem:[#allocation5 + $0x108] sm:$0xff]  ;;  %v310_v37 = vld [vmem:[#allocation5 + $0x110] sm:$0xff]  ;;  %v372_v38 = vadd.f32 %v308_v31, %v244_v30  ;;  %v247_v39 = vld [vmem:[%s958_s15 + $0x118] sm:$0xff] }
  0x3c   : > { %424 = vst [vmem:[%s973_s17 + $0xa0] sm:$0xff] %v360_v2  ;;  %v311_v40 = vld [vmem:[#allocation5 + $0x118] sm:$0xff]  ;;  %v373_v41 = vadd.f32 %v309_v34, %v245_v33  ;;  %v248_v42 = vld [vmem:[%s958_s15 + $0x120] sm:$0xff]  ;;  %v374_v44 = vadd.f32 %v310_v37, %v246_v36  ;;  %v249_v45 = vld [vmem:[%s958_s15 + $0x128] sm:$0xff] }
  0x3d   : > { %425 = vst [vmem:[%s973_s17 + $0xa8] sm:$0xff] %v361_v5  ;;  %v312_v43 = vld [vmem:[#allocation5 + $0x120] sm:$0xff]  ;;  %v313_v46 = vld [vmem:[#allocation5 + $0x128] sm:$0xff]  ;;  %v375_v47 = vadd.f32 %v311_v40, %v247_v39  ;;  %v250_v48 = vld [vmem:[%s958_s15 + $0x130] sm:$0xff] }
  0x3e   : > { %426 = vst [vmem:[%s973_s17 + $0xb0] sm:$0xff] %v362_v8  ;;  %v314_v49 = vld [vmem:[#allocation5 + $0x130] sm:$0xff]  ;;  %v376_v50 = vadd.f32 %v312_v43, %v248_v42  ;;  %v251_v51 = vld [vmem:[%s958_s15 + $0x138] sm:$0xff]  ;;  %v377_v53 = vadd.f32 %v313_v46, %v249_v45  ;;  %v252_v54 = vld [vmem:[%s958_s15 + $0x140] sm:$0xff] }
  0x3f   : > { %427 = vst [vmem:[%s973_s17 + $0xb8] sm:$0xff] %v363_v11  ;;  %v315_v52 = vld [vmem:[#allocation5 + $0x138] sm:$0xff]  ;;  %v316_v55 = vld [vmem:[#allocation5 + $0x140] sm:$0xff]  ;;  %v378_v56 = vadd.f32 %v314_v49, %v250_v48  ;;  %v253_v57 = vld [vmem:[%s958_s15 + $0x148] sm:$0xff] }
  0x40   : > { %428 = vst [vmem:[%s973_s17 + $0xc0] sm:$0xff] %v364_v14  ;;  %v317_v58 = vld [vmem:[#allocation5 + $0x148] sm:$0xff]  ;;  %v379_v59 = vadd.f32 %v315_v52, %v251_v51  ;;  %v254_v60 = vld [vmem:[%s958_s15 + $0x150] sm:$0xff]  ;;  %v380_v62 = vadd.f32 %v316_v55, %v252_v54  ;;  %v255_v63 = vld [vmem:[%s958_s15 + $0x158] sm:$0xff] }
  0x41   : > { %429 = vst [vmem:[%s973_s17 + $0xc8] sm:$0xff] %v365_v17  ;;  %v318_v61 = vld [vmem:[#allocation5 + $0x150] sm:$0xff]  ;;  %v319_v0 = vld [vmem:[#allocation5 + $0x158] sm:$0xff]  ;;  %v381_v1 = vadd.f32 %v317_v58, %v253_v57  ;;  %v256_v2 = vld [vmem:[%s958_s15 + $0x160] sm:$0xff] }
  0x42   : > { %430 = vst [vmem:[%s973_s17 + $0xd0] sm:$0xff] %v366_v20  ;;  %v320_v3 = vld [vmem:[#allocation5 + $0x160] sm:$0xff]  ;;  %v382_v4 = vadd.f32 %v318_v61, %v254_v60  ;;  %v257_v5 = vld [vmem:[%s958_s15 + $0x168] sm:$0xff]  ;;  %v383_v7 = vadd.f32 %v319_v0, %v255_v63  ;;  %v258_v8 = vld [vmem:[%s958_s15 + $0x170] sm:$0xff] }
  0x43   : > { %431 = vst [vmem:[%s973_s17 + $0xd8] sm:$0xff] %v367_v23  ;;  %v321_v6 = vld [vmem:[#allocation5 + $0x168] sm:$0xff]  ;;  %v322_v9 = vld [vmem:[#allocation5 + $0x170] sm:$0xff]  ;;  %v384_v10 = vadd.f32 %v320_v3, %v256_v2  ;;  %v259_v11 = vld [vmem:[%s958_s15 + $0x178] sm:$0xff] }
  0x44   : > { %432 = vst [vmem:[%s973_s17 + $0xe0] sm:$0xff] %v368_v26  ;;  %v323_v12 = vld [vmem:[#allocation5 + $0x178] sm:$0xff]  ;;  %v385_v13 = vadd.f32 %v321_v6, %v257_v5  ;;  %v260_v14 = vld [vmem:[%s958_s15 + $0x180] sm:$0xff]  ;;  %v386_v16 = vadd.f32 %v322_v9, %v258_v8  ;;  %v261_v17 = vld [vmem:[%s958_s15 + $0x188] sm:$0xff] }
  0x45   : > { %433 = vst [vmem:[%s973_s17 + $0xe8] sm:$0xff] %v369_v29  ;;  %v324_v15 = vld [vmem:[#allocation5 + $0x180] sm:$0xff]  ;;  %v325_v18 = vld [vmem:[#allocation5 + $0x188] sm:$0xff]  ;;  %v387_v19 = vadd.f32 %v323_v12, %v259_v11  ;;  %v262_v20 = vld [vmem:[%s958_s15 + $0x190] sm:$0xff] }
  0x46   : > { %434 = vst [vmem:[%s973_s17 + $0xf0] sm:$0xff] %v370_v32  ;;  %v326_v21 = vld [vmem:[#allocation5 + $0x190] sm:$0xff]  ;;  %v388_v22 = vadd.f32 %v324_v15, %v260_v14  ;;  %v263_v23 = vld [vmem:[%s958_s15 + $0x198] sm:$0xff]  ;;  %v389_v25 = vadd.f32 %v325_v18, %v261_v17  ;;  %v264_v26 = vld [vmem:[%s958_s15 + $0x1a0] sm:$0xff] }
  0x47   : > { %435 = vst [vmem:[%s973_s17 + $0xf8] sm:$0xff] %v371_v35  ;;  %v327_v24 = vld [vmem:[#allocation5 + $0x198] sm:$0xff]  ;;  %v328_v27 = vld [vmem:[#allocation5 + $0x1a0] sm:$0xff]  ;;  %v390_v28 = vadd.f32 %v326_v21, %v262_v20  ;;  %v265_v29 = vld [vmem:[%s958_s15 + $0x1a8] sm:$0xff] }
  0x48   : > { %436 = vst [vmem:[%s973_s17 + $0x100] sm:$0xff] %v372_v38  ;;  %v329_v30 = vld [vmem:[#allocation5 + $0x1a8] sm:$0xff]  ;;  %v391_v31 = vadd.f32 %v327_v24, %v263_v23  ;;  %v266_v32 = vld [vmem:[%s958_s15 + $0x1b0] sm:$0xff]  ;;  %v392_v34 = vadd.f32 %v328_v27, %v264_v26  ;;  %v267_v35 = vld [vmem:[%s958_s15 + $0x1b8] sm:$0xff] }
  0x49   : > { %437 = vst [vmem:[%s973_s17 + $0x108] sm:$0xff] %v373_v41  ;;  %v330_v33 = vld [vmem:[#allocation5 + $0x1b0] sm:$0xff]  ;;  %v331_v36 = vld [vmem:[#allocation5 + $0x1b8] sm:$0xff]  ;;  %v393_v37 = vadd.f32 %v329_v30, %v265_v29  ;;  %v268_v38 = vld [vmem:[%s958_s15 + $0x1c0] sm:$0xff] }
  0x4a   : > { %438 = vst [vmem:[%s973_s17 + $0x110] sm:$0xff] %v374_v44  ;;  %v332_v39 = vld [vmem:[#allocation5 + $0x1c0] sm:$0xff]  ;;  %v394_v40 = vadd.f32 %v330_v33, %v266_v32  ;;  %v269_v41 = vld [vmem:[%s958_s15 + $0x1c8] sm:$0xff]  ;;  %v395_v43 = vadd.f32 %v331_v36, %v267_v35  ;;  %v270_v44 = vld [vmem:[%s958_s15 + $0x1d0] sm:$0xff] }
  0x4b   : > { %439 = vst [vmem:[%s973_s17 + $0x118] sm:$0xff] %v375_v47  ;;  %v333_v42 = vld [vmem:[#allocation5 + $0x1c8] sm:$0xff]  ;;  %v334_v45 = vld [vmem:[#allocation5 + $0x1d0] sm:$0xff]  ;;  %v396_v46 = vadd.f32 %v332_v39, %v268_v38  ;;  %v271_v47 = vld [vmem:[%s958_s15 + $0x1d8] sm:$0xff] }
  0x4c   : > { %440 = vst [vmem:[%s973_s17 + $0x120] sm:$0xff] %v376_v50  ;;  %v335_v48 = vld [vmem:[#allocation5 + $0x1d8] sm:$0xff]  ;;  %v397_v49 = vadd.f32 %v333_v42, %v269_v41  ;;  %v272_v50 = vld [vmem:[%s958_s15 + $0x1e0] sm:$0xff]  ;;  %v398_v52 = vadd.f32 %v334_v45, %v270_v44  ;;  %v337_v54 = vld [vmem:[#allocation5 + $0x1e8] sm:$0xff] }
  0x4d   : > { %441 = vst [vmem:[%s973_s17 + $0x128] sm:$0xff] %v377_v53  ;;  %v336_v51 = vld [vmem:[#allocation5 + $0x1e0] sm:$0xff]  ;;  %v273_v53 = vld [vmem:[%s958_s15 + $0x1e8] sm:$0xff]  ;;  %v399_v55 = vadd.f32 %v335_v48, %v271_v47  ;;  %v338_v57 = vld [vmem:[#allocation5 + $0x1f0] sm:$0xff] }
  0x4e   : > { %442 = vst [vmem:[%s973_s17 + $0x130] sm:$0xff] %v378_v56  ;;  %v274_v56 = vld [vmem:[%s958_s15 + $0x1f0] sm:$0xff]  ;;  %v400_v58 = vadd.f32 %v336_v51, %v272_v50  ;;  %v339_v60 = vld [vmem:[#allocation5 + $0x1f8] sm:$0xff]  ;;  %v401_v61 = vadd.f32 %v337_v54, %v273_v53 }
  0x4f   : > { %443 = vst [vmem:[%s973_s17 + $0x138] sm:$0xff] %v379_v59  ;;  %v275_v59 = vld [vmem:[%s958_s15 + $0x1f8] sm:$0xff] }
  0x50   : > { %444 = vst [vmem:[%s973_s17 + $0x140] sm:$0xff] %v380_v62  ;;  %v402_v62 = vadd.f32 %v338_v57, %v274_v56  ;;  %v403_v63 = vadd.f32 %v339_v60, %v275_v59 }
  0x51   : > { %445 = vst [vmem:[%s973_s17 + $0x148] sm:$0xff] %v381_v1 }
  0x52   : > { %446 = vst [vmem:[%s973_s17 + $0x150] sm:$0xff] %v382_v4 }
  0x53   : > { %447 = vst [vmem:[%s973_s17 + $0x158] sm:$0xff] %v383_v7 }
  0x54   : > { %448 = vst [vmem:[%s973_s17 + $0x160] sm:$0xff] %v384_v10 }
  0x55   : > { %449 = vst [vmem:[%s973_s17 + $0x168] sm:$0xff] %v385_v13 }
  0x56   : > { %450 = vst [vmem:[%s973_s17 + $0x170] sm:$0xff] %v386_v16 }
  0x57   : > { %451 = vst [vmem:[%s973_s17 + $0x178] sm:$0xff] %v387_v19 }
  0x58   : > { %452 = vst [vmem:[%s973_s17 + $0x180] sm:$0xff] %v388_v22 }
  0x59   : > { %453 = vst [vmem:[%s973_s17 + $0x188] sm:$0xff] %v389_v25 }
  0x5a   : > { %454 = vst [vmem:[%s973_s17 + $0x190] sm:$0xff] %v390_v28 }
  0x5b   : > { %455 = vst [vmem:[%s973_s17 + $0x198] sm:$0xff] %v391_v31 }
  0x5c   : > { %456 = vst [vmem:[%s973_s17 + $0x1a0] sm:$0xff] %v392_v34 }
  0x5d   : > { %457 = vst [vmem:[%s973_s17 + $0x1a8] sm:$0xff] %v393_v37 }
  0x5e   : > { %458 = vst [vmem:[%s973_s17 + $0x1b0] sm:$0xff] %v394_v40 }
  0x5f   : > { %459 = vst [vmem:[%s973_s17 + $0x1b8] sm:$0xff] %v395_v43 }
  0x60   : > { %460 = vst [vmem:[%s973_s17 + $0x1c0] sm:$0xff] %v396_v46 }
  0x61   : > { %461 = vst [vmem:[%s973_s17 + $0x1c8] sm:$0xff] %v397_v49 }
  0x62   : > { %462 = vst [vmem:[%s973_s17 + $0x1d0] sm:$0xff] %v398_v52 }
  0x63   : > { %463 = vst [vmem:[%s973_s17 + $0x1d8] sm:$0xff] %v399_v55 }
  0x64   : > { %464 = vst [vmem:[%s973_s17 + $0x1e0] sm:$0xff] %v400_v58 }
  0x65   : > { %465 = vst [vmem:[%s973_s17 + $0x1e8] sm:$0xff] %v401_v61 }
  0x66   : > { %466 = vst [vmem:[%s973_s17 + $0x1f0] sm:$0xff] %v402_v62 }
  0x67   : > { %467 = vst [vmem:[%s973_s17 + $0x1f8] sm:$0xff] %v403_v63 }
  0x68   : > { %769 = shalt.err (!%p766_p12)
}
  0x69   : > { %s833_s30 = smov 256   ;;  %s834_s5 = smov 16  }
  0x6a   : > { %611 = dma.vmem_to_hbm [thread:$0]  (%p931_p3), %s485_s28, 8192, %s487_s3, %s469_s6, %s833_s30, %s833_s30, %s834_s5  }
  0x6b PF: > { %p628_p13 = scmp.ge.s32.totalorder %s828_s14, 2  ;;  %s501_s7 = sand.u32 1, %s808_s9  }
  0x6c   : > { %s502_s15 = scalar_lea.sflag [#allocation4], %s501_s7 }
  0x6d   : > { %p622_p0 = pnand %p628_p13, %p899_p6 }
  0x6f   : > { %p623_p5 = pneg %p622_p0 }
  0x71   : > { %803 = dma.done.wait (%p623_p5), %s502_s15, 8192  }
  0x72   : > { %805 = vsyncadd (%p623_p5), %s502_s15, 4294959104  ;;  %s19_s14 = sadd.s32 1, %s828_s14   ;;  %s1146_s9 = smov %s812_s10 }
  0x73   : > { %p16_p7 = scmp.ge.s32.totalorder %s19_s14, 6   ;;  %s1147_s10 = smov %s816_s11 }
  0x74   : > { %s1148_s11 = smov %s940_s8  ;;  %s1149_s12 = smov %s824_s13 }
  0x75   : > { %s1150_s13 = smov %s1152_s29  ;;  %18 = sbr.rel (!%p16_p7) target bundleno = 7 (0x7), region = 78 }
  0x7a   :  { %508 = vsyncpa [#allocation3], 1 }
  0x7b   :  { %510 = vsyncpa [#allocation3 + $0x1], 1 }
  0x7c   :  { %511 = vsyncpa [#allocation6], 1 }
  0x7d   :  { %512 = vsyncpa [#allocation4], 1 }
  0x7e   :  { %514 = vsyncpa [#allocation4 + $0x1], 1 }

</bundles_post_ra>
